<compile_context>
chip_gen: v7x
topology: tpu7x:2x2x1
jax: 0.10.0
libtpu: 0.0.40
codegen_flags: <defaults>
</compile_context>

<pallas_src>
import math

import jax
import jax.numpy as jnp
from jax.experimental import pallas as pl
from jax.experimental.pallas import tpu as pltpu


# --------------------------------- tiling helpers ---------------------------------
def _round_up(v, m):
    return ((v + m - 1) // m) * m


def _choose_tiles(n):
    """Return (n_pad, tm, tk): padded N, row tile, reduction tile."""
    if n <= 512:
        n_pad = _round_up(n, 8)
        return n_pad, n_pad, n_pad          # single tile, everything fits in VMEM
    # 256 x 512 bf16 adjacency tiles (~256 KiB each) double-buffer comfortably under
    # the 32 MiB scoped-VMEM default -> safe on v7x (64 MiB phys) and v5e/v6e.
    return _round_up(n, 512), 256, 512


# ---------------- Kernel 1: GCNConv (+ ReLU) and TopK projection score ----------------
def gcn_kernel(adj_ref, x_ref, w_ref, b_ref, p_ref, h_ref, s_ref, acc_ref):
    k = pl.program_id(1)

    @pl.when(k == 0)
    def _():
        acc_ref[...] = jnp.zeros_like(acc_ref)

    # Tiled A_hat @ X aggregation (bf16 operands, f32 accumulation on the MXU).
    acc_ref[...] += jnp.dot(adj_ref[...], x_ref[...],
                            preferred_element_type=jnp.float32)

    @pl.when(k == pl.num_programs(1) - 1)
    def _():
        # (A_hat @ X) @ W == A_hat @ (X @ W); W is tiny, applied once per row tile.
        ax = acc_ref[...].astype(jnp.bfloat16)
        h = jnp.dot(ax, w_ref[...], preferred_element_type=jnp.float32) + b_ref[...]
        h = jnp.maximum(h, 0.0)                       # ReLU in f32 (v5e-friendly VPU)
        h_ref[...] = h
        # TopKPooling score = tanh(H @ p_hat): VPU multiply + lane reduce (EUP tanh),
        # avoids a 1-column MXU matvec.  The (tm, 1) store is negligible traffic.
        s_ref[...] = jnp.tanh(jnp.sum(h * p_ref[...], axis=-1, keepdims=True))


def gcn_and_score(adj, x, w, b, p_hat, n_pad, tm, tk, f_in, f_out):
    grid = (n_pad // tm, n_pad // tk)
    flops = 2 * n_pad * n_pad * f_in + 2 * n_pad * f_in * f_out
    bytes_accessed = int(adj.size * 2 + x.size * 2 + w.size * 2
                         + n_pad * f_out * 4 + n_pad * 4)
    return pl.pallas_call(
        gcn_kernel,
        out_shape=(jax.ShapeDtypeStruct((n_pad, f_out), jnp.float32),
                   jax.ShapeDtypeStruct((n_pad, 1), jnp.float32)),
        grid_spec=pltpu.PrefetchScalarGridSpec(
            num_scalar_prefetch=0,
            grid=grid,
            in_specs=[
                pl.BlockSpec((tm, tk), lambda i, k: (i, k)),       # A_hat tile (bf16)
                pl.BlockSpec((tk, f_in), lambda i, k: (k, 0)),     # X tile    (bf16)
                pl.BlockSpec((f_in, f_out), lambda i, k: (0, 0)),  # W         (bf16)
                pl.BlockSpec((1, f_out), lambda i, k: (0, 0)),     # bias      (f32)
                pl.BlockSpec((1, f_out), lambda i, k: (0, 0)),     # p_hat row (f32)
            ],
            out_specs=(
                pl.BlockSpec((tm, f_out), lambda i, k: (i, 0)),    # H (resident over k)
                pl.BlockSpec((tm, 1), lambda i, k: (i, 0)),        # score
            ),
            scratch_shapes=[pltpu.VMEM((tm, f_in), jnp.float32)],  # f32 accumulator
        ),
        compiler_params=pltpu.CompilerParams(
            dimension_semantics=("parallel", "arbitrary"),         # rows shard over v7x's 2 TCs
            vmem_limit_bytes=32 * 1024 * 1024,
        ),
        cost_estimate=pl.CostEstimate(flops=flops, transcendentals=n_pad,
                                      bytes_accessed=bytes_accessed),
    )(adj, x, w, b, p_hat)


# ------ Kernel 2: TopK gating + masked GlobalAttention (online softmax) + MLP head ------
def head_kernel(h_ref, s_ref, mask_ref, gw_ref, gb_ref, w1_ref, b1_ref, w2_ref, b2_ref,
                w3_ref, b3_ref, o_ref, m_ref, l_ref, acc_ref):
    i = pl.program_id(0)

    @pl.when(i == 0)
    def _():
        m_ref[...] = jnp.full_like(m_ref, -1e30)
        l_ref[...] = jnp.zeros_like(l_ref)
        acc_ref[...] = jnp.zeros_like(acc_ref)

    mask = mask_ref[...]                               # (tm, 1): 1.0 for top-k nodes
    xs = h_ref[...] * s_ref[...]                       # TopKPooling gating x * score
    # GlobalAttention gate via VPU multiply + lane reduce (no 1-wide MXU matvec).
    gate = jnp.sum(xs * gw_ref[...], axis=-1, keepdims=True) + gb_ref[...]
    gate = jnp.where(mask > 0.0, gate, -1e30)          # drop non-selected / padded nodes
    # Online masked softmax over node tiles.
    m_new = jnp.maximum(m_ref[...], jnp.max(gate, axis=0, keepdims=True))
    alpha = jnp.exp(m_ref[...] - m_new)
    p = jnp.exp(gate - m_new) * mask
    l_ref[...] = alpha * l_ref[...] + jnp.sum(p, axis=0, keepdims=True)
    acc_ref[...] = alpha * acc_ref[...] + jnp.sum(p * xs, axis=0, keepdims=True)
    m_ref[...] = m_new

    @pl.when(i == pl.num_programs(0) - 1)
    def _():
        pooled = acc_ref[...] / l_ref[...]             # (1, F_out)
        # 1-row MLP / classifier: MXU-latency-bound but executed exactly once; f32.
        h1 = jnp.maximum(jnp.dot(pooled, w1_ref[...],
                                 preferred_element_type=jnp.float32) + b1_ref[...], 0.0)
        h2 = jnp.maximum(jnp.dot(h1, w2_ref[...],
                                 preferred_element_type=jnp.float32) + b2_ref[...], 0.0)
        logits = jnp.dot(h2, w3_ref[...],
                         preferred_element_type=jnp.float32) + b3_ref[...]
        logits = logits - jnp.max(logits, axis=1, keepdims=True)
        e = jnp.exp(logits)
        o_ref[...] = e / jnp.sum(e, axis=1, keepdims=True)


def attention_mlp_head(h, score, mask, params, n_pad, tm, f_out):
    hidden = params["w1"].shape[1]
    grid = (n_pad // tm,)
    return pl.pallas_call(
        head_kernel,
        out_shape=jax.ShapeDtypeStruct((1, 2), jnp.float32),
        grid_spec=pltpu.PrefetchScalarGridSpec(
            num_scalar_prefetch=0,
            grid=grid,
            in_specs=[
                pl.BlockSpec((tm, f_out), lambda i: (i, 0)),        # H tile
                pl.BlockSpec((tm, 1), lambda i: (i, 0)),            # score tile
                pl.BlockSpec((tm, 1), lambda i: (i, 0)),            # top-k mask tile
                pl.BlockSpec((1, f_out), lambda i: (0, 0)),         # gate weight row
                pl.BlockSpec((1, 1), lambda i: (0, 0)),             # gate bias
                pl.BlockSpec((f_out, hidden), lambda i: (0, 0)),
                pl.BlockSpec((1, hidden), lambda i: (0, 0)),
                pl.BlockSpec((hidden, hidden), lambda i: (0, 0)),
                pl.BlockSpec((1, hidden), lambda i: (0, 0)),
                pl.BlockSpec((hidden, 2), lambda i: (0, 0)),
                pl.BlockSpec((1, 2), lambda i: (0, 0)),
            ],
            out_specs=pl.BlockSpec((1, 2), lambda i: (0, 0)),
            scratch_shapes=[pltpu.VMEM((1, 1), jnp.float32),        # running max
                            pltpu.VMEM((1, 1), jnp.float32),        # running denom
                            pltpu.VMEM((1, f_out), jnp.float32)],   # running numerator
        ),
        compiler_params=pltpu.CompilerParams(
            dimension_semantics=("arbitrary",)),                    # sequential carry
    )(h, score, mask,
      params["gate_w"].reshape(1, f_out), params["gate_b"],
      params["w1"], params["b1"], params["w2"], params["b2"],
      params["w3"], params["b3"])


# ----------------------------------- Model wrapper -----------------------------------
def build_normalized_adj(edge_index, num_nodes):
    """A_hat = D^-1/2 (A + I) D^-1/2 with A[dst, src] = 1 (GCNConv gcn_norm), f32."""
    src, dst = edge_index[0], edge_index[1]
    a = jnp.zeros((num_nodes, num_nodes), jnp.float32).at[dst, src].add(1.0)
    a = a + jnp.eye(num_nodes, dtype=jnp.float32)
    deg = jnp.sum(a, axis=1)
    dinv = 1.0 / jnp.sqrt(deg)
    return dinv[:, None] * a * dinv[None, :]


def deepwukong_forward(x, edge_index, params, ratio=0.8):
    n, f_in = x.shape
    f_out = params["gcn_w"].shape[1]
    n_pad, tm, tk = _choose_tiles(n)

    # TODO(synk): for realistic CPG graphs (E ~ 2N) a CSR SpMM with scalar-prefetched
    # row offsets would replace this O(N^2) dense adjacency; kept dense here.
    adj = build_normalized_adj(edge_index, n)
    pad_n = n_pad - n
    adj_p = jnp.pad(adj, ((0, pad_n), (0, pad_n))).astype(jnp.bfloat16)   # bf16 MXU operand
    x_p = jnp.pad(x, ((0, pad_n), (0, 0))).astype(jnp.bfloat16)

    # Pre-normalize the TopK projection vector once (with eps -> no NaN for zero p).
    p = params["topk_p"]                                                  # (f_out, 1)
    p_hat = (p / (jnp.sqrt(jnp.sum(p * p)) + 1e-12)).reshape(1, f_out)

    # Kernel 1: GCNConv + ReLU + TopK score (tiled, pipelined, bf16 MXU / f32 acc).
    h, score = gcn_and_score(adj_p, x_p, params["gcn_w"].astype(jnp.bfloat16),
                             params["gcn_b"], p_hat, n_pad, tm, tk, f_in, f_out)

    # TopKPooling node selection (single graph batch).
    # TODO(synk): top-k sort/selection has no clean Pallas path; done with lax.top_k.
    k = int(math.ceil(ratio * n))
    _, perm = jax.lax.top_k(score[:n, 0], k)
    # Feed the selection back as a 0/1 mask -> no K x F gather between the kernels.
    mask = jnp.zeros((n_pad,), jnp.float32).at[perm].set(1.0)[:, None]

    # Kernel 2: gating + masked GlobalAttention pooling + MLP head + softmax.
    return attention_mlp_head(h, score, mask, params, n_pad, tm, f_out)


def init_params(key, input_dim, output_dim):
    hidden = 2 * output_dim
    keys = jax.random.split(key, 10)
    s = 0.1
    return {
        "gcn_w":  s * jax.random.normal(keys[0], (input_dim, output_dim), jnp.float32),
        "gcn_b":  s * jax.random.normal(keys[1], (1, output_dim), jnp.float32),
        "topk_p": s * jax.random.normal(keys[2], (output_dim, 1), jnp.float32),
        "gate_w": s * jax.random.normal(keys[3], (output_dim, 1), jnp.float32),
        "gate_b": s * jax.random.normal(keys[4], (1, 1), jnp.float32),
        "w1": s * jax.random.normal(keys[5], (output_dim, hidden), jnp.float32),
        "b1": s * jax.random.normal(keys[6], (1, hidden), jnp.float32),
        "w2": s * jax.random.normal(keys[7], (hidden, hidden), jnp.float32),
        "b2": s * jax.random.normal(keys[8], (1, hidden), jnp.float32),
        "w3": s * jax.random.normal(keys[9], (hidden, 2), jnp.float32),
        "b3": jnp.zeros((1, 2), jnp.float32),
    }


if __name__ == "__main__":
    # Small synthetic graph consistent with the module: N nodes, input_dim features,
    # GCN output_dim features, hidden = 2 * output_dim, 2-way classifier.
    N, INPUT_DIM, OUTPUT_DIM = 16, 32, 32

    key = jax.random.PRNGKey(0)
    k_x, k_p = jax.random.split(key)

    x = jax.random.normal(k_x, (N, INPUT_DIM), jnp.float32)

    # deterministic edge_index [2, E]: ring + skip-5 connections (directed)
    idx = jnp.arange(N, dtype=jnp.int32)
    src = jnp.concatenate([idx, idx])
    dst = jnp.concatenate([(idx + 1) % N, (idx + 5) % N])
    edge_index = jnp.stack([src, dst])                  # [2, 32]

    params = init_params(k_p, INPUT_DIM, OUTPUT_DIM)

    out = deepwukong_forward(x, edge_index, params)
    out = jax.block_until_ready(out)
    assert out.shape == (1, 2)
    assert bool(jnp.isclose(jnp.sum(out), 1.0, atol=1e-5))
    print("KERNEL_OK")
</pallas_src>

<mosaic_0001>
module attributes {stable_mosaic.version = 11 : i64} {
  func.func @gcn_kernel(%arg0: i32, %arg1: i32, %arg2: memref<16x16xbf16, #tpu.memory_space<vmem>>, %arg3: memref<16x32xbf16, #tpu.memory_space<vmem>>, %arg4: memref<32x32xbf16, #tpu.memory_space<vmem>>, %arg5: memref<1x32xf32, #tpu.memory_space<vmem>>, %arg6: memref<1x32xf32, #tpu.memory_space<vmem>>, %arg7: memref<16x32xf32, #tpu.memory_space<vmem>>, %arg8: memref<16x1xf32, #tpu.memory_space<vmem>>, %arg9: memref<16x32xf32, #tpu.memory_space<vmem>>) attributes {dimension_semantics = [#tpu.dimension_semantics<parallel>, #tpu.dimension_semantics<arbitrary>], iteration_bounds = array<i64: 1, 1>, scalar_prefetch = 0 : i64, scratch_operands = 1 : i64, tpu.core_type = #tpu.core_type<tc>, window_params = [{transform_indices = @transform_0, window_bounds = array<i64: 16, 16>}, {transform_indices = @transform_1, window_bounds = array<i64: 16, 32>}, {pipeline_mode = #tpu.pipeline_mode<synchronous>, transform_indices = @transform_2, window_bounds = array<i64: 32, 32>}, {pipeline_mode = #tpu.pipeline_mode<synchronous>, transform_indices = @transform_3, window_bounds = array<i64: 1, 32>}, {pipeline_mode = #tpu.pipeline_mode<synchronous>, transform_indices = @transform_4, window_bounds = array<i64: 1, 32>}, {transform_indices = @transform_5, window_bounds = array<i64: 16, 32>}, {transform_indices = @transform_6, window_bounds = array<i64: 16, 1>}]} {
    %c0_i32 = arith.constant 0 : i32
    %0 = arith.cmpi eq, %arg1, %c0_i32 : i32
    %1 = arith.extui %0 : i1 to i32
    %c0_i32_0 = arith.constant 0 : i32
    %2 = arith.cmpi ne, %1, %c0_i32_0 : i32
    scf.if %2 {
      %cst_10 = arith.constant 0.000000e+00 : f32
      %12 = vector.broadcast %cst_10 : f32 to vector<16x32xf32>
      %c0_11 = arith.constant 0 : index
      %c0_12 = arith.constant 0 : index
      %13 = vector.load %arg9[%c0_11, %c0_12] : memref<16x32xf32, #tpu.memory_space<vmem>>, vector<16x32xf32>
      tpu.vector_store %arg9[%c0_11, %c0_12], %12 {strides = array<i32>} : memref<16x32xf32, #tpu.memory_space<vmem>>, vector<16x32xf32>,
    } else {
    }
    %c0 = arith.constant 0 : index
    %c0_1 = arith.constant 0 : index
    %3 = vector.load %arg9[%c0, %c0_1] : memref<16x32xf32, #tpu.memory_space<vmem>>, vector<16x32xf32>
    %c0_2 = arith.constant 0 : index
    %c0_3 = arith.constant 0 : index
    %4 = vector.load %arg2[%c0_2, %c0_3] : memref<16x16xbf16, #tpu.memory_space<vmem>>, vector<16x16xbf16>
    %c0_4 = arith.constant 0 : index
    %c0_5 = arith.constant 0 : index
    %5 = vector.load %arg3[%c0_4, %c0_5] : memref<16x32xbf16, #tpu.memory_space<vmem>>, vector<16x32xbf16>
    %cst = arith.constant dense<0.000000e+00> : vector<16x32xf32>
    %6 = tpu.matmul %4, %5, %cst {dimension_numbers = #tpu.dot_dimension_numbers<[1], [0], [0], [1], [0, 0, 1, 1], [], []>} : vector<16x16xbf16>, vector<16x32xbf16>, vector<16x32xf32> -> vector<16x32xf32>
    %7 = arith.addf %3, %6 : vector<16x32xf32>
    %c0_6 = arith.constant 0 : index
    %c0_7 = arith.constant 0 : index
    %8 = vector.load %arg9[%c0_6, %c0_7] : memref<16x32xf32, #tpu.memory_space<vmem>>, vector<16x32xf32>
    tpu.vector_store %arg9[%c0_6, %c0_7], %7 {strides = array<i32>} : memref<16x32xf32, #tpu.memory_space<vmem>>, vector<16x32xf32>,
    %c0_i32_8 = arith.constant 0 : i32
    %9 = arith.cmpi eq, %arg1, %c0_i32_8 : i32
    %10 = arith.extui %9 : i1 to i32
    %c0_i32_9 = arith.constant 0 : i32
    %11 = arith.cmpi ne, %10, %c0_i32_9 : i32
    scf.if %11 {
      %c0_10 = arith.constant 0 : index
      %c0_11 = arith.constant 0 : index
      %12 = vector.load %arg9[%c0_10, %c0_11] : memref<16x32xf32, #tpu.memory_space<vmem>>, vector<16x32xf32>
      %13 = arith.truncf %12 : vector<16x32xf32> to vector<16x32xbf16>
      %c0_12 = arith.constant 0 : index
      %c0_13 = arith.constant 0 : index
      %14 = vector.load %arg4[%c0_12, %c0_13] : memref<32x32xbf16, #tpu.memory_space<vmem>>, vector<32x32xbf16>
      %cst_14 = arith.constant dense<0.000000e+00> : vector<16x32xf32>
      %15 = tpu.matmul %13, %14, %cst_14 {dimension_numbers = #tpu.dot_dimension_numbers<[1], [0], [0], [1], [0, 0, 1, 1], [], []>} : vector<16x32xbf16>, vector<32x32xbf16>, vector<16x32xf32> -> vector<16x32xf32>
      %c0_15 = arith.constant 0 : index
      %c0_16 = arith.constant 0 : index
      %16 = vector.load %arg5[%c0_15, %c0_16] : memref<1x32xf32, #tpu.memory_space<vmem>>, vector<1x32xf32>
      %17 = vector.broadcast %16 : vector<1x32xf32> to vector<16x32xf32>
      %18 = arith.addf %15, %17 : vector<16x32xf32>
      %cst_17 = arith.constant 0.000000e+00 : f32
      %19 = vector.broadcast %cst_17 : f32 to vector<16x32xf32>
      %20 = arith.maximumf %18, %19 : vector<16x32xf32>
      %c0_18 = arith.constant 0 : index
      %c0_19 = arith.constant 0 : index
      %21 = vector.load %arg7[%c0_18, %c0_19] : memref<16x32xf32, #tpu.memory_space<vmem>>, vector<16x32xf32>
      tpu.vector_store %arg7[%c0_18, %c0_19], %20 {strides = array<i32>} : memref<16x32xf32, #tpu.memory_space<vmem>>, vector<16x32xf32>,
      %c0_20 = arith.constant 0 : index
      %c0_21 = arith.constant 0 : index
      %22 = vector.load %arg6[%c0_20, %c0_21] : memref<1x32xf32, #tpu.memory_space<vmem>>, vector<1x32xf32>
      %23 = vector.broadcast %22 : vector<1x32xf32> to vector<16x32xf32>
      %24 = arith.mulf %20, %23 : vector<16x32xf32>
      %cst_22 = arith.constant dense<0.000000e+00> : vector<16xf32>
      %25 = vector.multi_reduction <add>, %24, %cst_22 [1] : vector<16x32xf32> to vector<16xf32>
      %26 = vector.shape_cast %25 : vector<16xf32> to vector<16x1xf32>
      %27 = math.tanh %26 : vector<16x1xf32>
      %c0_23 = arith.constant 0 : index
      %c0_24 = arith.constant 0 : index
      %28 = vector.load %arg8[%c0_23, %c0_24] : memref<16x1xf32, #tpu.memory_space<vmem>>, vector<16x1xf32>
      tpu.vector_store %arg8[%c0_23, %c0_24], %27 {strides = array<i32>} : memref<16x1xf32, #tpu.memory_space<vmem>>, vector<16x1xf32>,
    } else {
    }
    return
  }
  func.func @transform_0(%arg0: i32, %arg1: i32) -> (i32, i32) {
    %c0_i32 = arith.constant 0 : i32
    return %arg0, %arg1 : i32, i32
  }
  func.func @transform_1(%arg0: i32, %arg1: i32) -> (i32, i32) {
    %c0_i32 = arith.constant 0 : i32
    %c0_i32_0 = arith.constant 0 : i32
    return %arg1, %c0_i32 : i32, i32
  }
  func.func @transform_2(%arg0: i32, %arg1: i32) -> (i32, i32) {
    %c0_i32 = arith.constant 0 : i32
    %c0_i32_0 = arith.constant 0 : i32
    %c0_i32_1 = arith.constant 0 : i32
    return %c0_i32, %c0_i32_0 : i32, i32
  }
  func.func @transform_3(%arg0: i32, %arg1: i32) -> (i32, i32) {
    %c0_i32 = arith.constant 0 : i32
    %c0_i32_0 = arith.constant 0 : i32
    %c0_i32_1 = arith.constant 0 : i32
    return %c0_i32, %c0_i32_0 : i32, i32
  }
  func.func @transform_4(%arg0: i32, %arg1: i32) -> (i32, i32) {
    %c0_i32 = arith.constant 0 : i32
    %c0_i32_0 = arith.constant 0 : i32
    %c0_i32_1 = arith.constant 0 : i32
    return %c0_i32, %c0_i32_0 : i32, i32
  }
  func.func @transform_5(%arg0: i32, %arg1: i32) -> (i32, i32) {
    %c0_i32 = arith.constant 0 : i32
    %c0_i32_0 = arith.constant 0 : i32
    return %arg0, %c0_i32 : i32, i32
  }
  func.func @transform_6(%arg0: i32, %arg1: i32) -> (i32, i32) {
    %c0_i32 = arith.constant 0 : i32
    %c0_i32_0 = arith.constant 0 : i32
    return %arg0, %c0_i32 : i32, i32
  }
}

</mosaic_0001>

<bundles_post_ra>
// kernel: tpu_custom_call.1
= control target key start
LH: loop header
LB: loop body
LE: loop exit
PB: predicated region body
PF: predicated region fallthrough
CT: control target
= control target key end

     0   :  { %12 = vsyncpa [#allocation4], 0  ;;  %s527_s0 = inlined_call_operand.hbm [shape: bf16[16,16], index: 0, kind: input, shape index: {}]   ;;  %s528_s1 = inlined_call_operand.hbm [shape: bf16[16,32], index: 1, kind: input, shape index: {}]   ;;  %s529_s2 = inlined_call_operand.hbm [shape: bf16[32,32], index: 2, kind: input, shape index: {}]   ;;  %s530_s3 = inlined_call_operand.vmem [shape: f32[1,32], index: 3, kind: input, shape index: {}]   ;;  %s531_s4 = inlined_call_operand.vmem [shape: f32[1,32], index: 4, kind: input, shape index: {}]   ;;  %s532_s5 = inlined_call_operand.hbm [shape: f32[16,32], index: 5, kind: output, shape index: {0}]   ;;  %s533_s6 = inlined_call_operand.vmem [shape: f32[16,1], index: 6, kind: output, shape index: {1}]  }
   0x1   :  { %13 = vsyncpa [#allocation7], 0 }
   0x2   :  { %14 = vsyncpa [#allocation5], 0  ;;  %s397_s21 = smov [#allocation6]   ;;  %s398_s23 = smov [#allocation3]  }
   0x3   :  { %s32_s22 = sshll.u32 %s397_s21, 4  ;;  %s20_s24 = sshll.u32 %s398_s23, 4  ;;  %s33_s22 = int_to_ptr.vmem [resolvable:$true] %s32_s22  ;;  %s442_s24 = int_to_ptr.vmem [resolvable:$true] %s20_s24 }
   0x4   :  { %s303_s27 = scalar_lea.hbm %s528_s1, 128 }
   0x5   :  { %p304_p0 = scmp.ne.s32.totalorder %s528_s1, %s303_s27  ;;  %p307_p1 = scmp.lt.u32.totalorder %s303_s27, %s528_s1 }
   0x7   :  { %p309_p2 = pnand %p307_p1, %p304_p0 }
   0x9   :  { %312 = shalt.err (!%p309_p2)
}
   0xa   :  { %s313_s8 = scalar_lea.vmem %s33_s22, 128  ;;  %p318_p4 = scmp.lt.s32.totalorder %s33_s22, %s33_s22 }
   0xb   :  { %p314_p3 = scmp.ne.s32.totalorder %s33_s22, %s313_s8  ;;  %p319_p5 = scmp.lt.s32.totalorder %s313_s8, %s313_s8 }
   0xd   :  { %p320_p6 = por %p319_p5, %p318_p4 }
   0xf   :  { %p321_p7 = pnand %p320_p6, %p314_p3 }
  0x11   :  { %324 = shalt.err (!%p321_p7)
}
  0x12   :  { %s399_s9 = smov 64   ;;  %s400_s10 = smov 4  }
  0x13   :  { %38 = dma.hbm_to_vmem [thread:$0]  %s528_s1, 128, %s33_s22, [#allocation7], %s399_s9, %s399_s9, %s400_s10  }
  0x14   :  { %s325_s15 = scalar_lea.hbm %s527_s0, 128 }
  0x15   :  { %p326_p8 = scmp.ne.s32.totalorder %s527_s0, %s325_s15  ;;  %p329_p9 = scmp.lt.u32.totalorder %s325_s15, %s527_s0 }
  0x17   :  { %p331_p10 = pnand %p329_p9, %p326_p8 }
  0x19   :  { %334 = shalt.err (!%p331_p10)
}
  0x1a   :  { %s335_s20 = scalar_lea.vmem %s442_s24, 128  ;;  %p340_p12 = scmp.lt.s32.totalorder %s442_s24, %s442_s24 }
  0x1b   :  { %p336_p11 = scmp.ne.s32.totalorder %s442_s24, %s335_s20  ;;  %p341_p13 = scmp.lt.s32.totalorder %s335_s20, %s335_s20 }
  0x1d   :  { %p342_p0 = por %p341_p13, %p340_p12 }
  0x1f   :  { %p343_p1 = pnand %p342_p0, %p336_p11 }
  0x21   :  { %346 = shalt.err (!%p343_p1)
}
  0x22   :  { %26 = dma.hbm_to_vmem [thread:$0]  %s527_s0, 128, %s442_s24, [#allocation4], %s399_s9, %s399_s9, %s400_s10  }
  0x23   :  { %s401_s22 = smov [#allocation8]   ;;  %s347_s27 = scalar_lea.hbm %s529_s2, 256 }
  0x24   :  { %s44_s23 = sshll.u32 %s401_s22, 4  ;;  %p348_p2 = scmp.ne.s32.totalorder %s529_s2, %s347_s27  ;;  %s45_s23 = int_to_ptr.vmem [resolvable:$true] %s44_s23 }
  0x25   :  { %p351_p3 = scmp.lt.u32.totalorder %s347_s27, %s529_s2 }
  0x27   :  { %p353_p4 = pnand %p351_p3, %p348_p2 }
  0x29   :  { %356 = shalt.err (!%p353_p4)
}
  0x2a   :  { %s357_s8 = scalar_lea.vmem %s45_s23, 256  ;;  %p362_p6 = scmp.lt.s32.totalorder %s45_s23, %s45_s23 }
  0x2b   :  { %p358_p5 = scmp.ne.s32.totalorder %s45_s23, %s357_s8  ;;  %p363_p7 = scmp.lt.s32.totalorder %s357_s8, %s357_s8 }
  0x2d   :  { %p364_p8 = por %p363_p7, %p362_p6 }
  0x2f   :  { %p365_p9 = pnand %p364_p8, %p358_p5 }
  0x31   :  { %368 = shalt.err (!%p365_p9)
}
  0x32   :  { %50 = dma.hbm_to_vmem [thread:$0]  %s529_s2, 256, %s45_s23, [#allocation7], %s399_s9, %s399_s9, %s400_s10  }
  0x33   :  { %391 = dma.done.wait [#allocation4], 128  }
  0x34   :  { %392 = vsyncadd [#allocation4], 4294967168 }
  0x35   :  { %393 = dma.done.wait [#allocation7], 384  }
  0x36   :  { %394 = vsyncadd [#allocation7], 4294966912  ;;  %vm69_vm0 = vcmask 261120   ;;  %v402_v0 = vmov 0.0   ;;  %vm403_vm1 = vmmov 0   ;;  %v295_v1 = vld [vmem:[#allocation6] sm:$0xff]  }
  0x37   :  { %271 = vmatprep.subr.bf16.mxu0 %v402_v0  ;;  %273 = vmatprep.mubr.msk.bf16.mxu0 %vm403_vm1, %v402_v0  ;;  %70 = vst.msk [vmem:[#allocation2] sm:$0xff] %vm69_vm0, %v402_v0  ;;  %71 = vst.msk [vmem:[#allocation2 + $0x8] sm:$0xff] %vm69_vm0, %v402_v0  ;;  %v296_v2 = vld [vmem:[#allocation3] sm:$0xff]   ;;  %vm89_vm2 = vcmask 130048   ;;  %v297_v3 = vld [vmem:[#allocation8] sm:$0xff]  }
  0x38   :  { %277 = vmatprep.subr.bf16.mxu1 %v402_v0  ;;  %281 = vmatprep.mubr.msk.bf16.mxu1 %vm403_vm1, %v402_v0  ;;  %v298_v4 = vld [vmem:[#allocation8 + $0x8] sm:$0xff]   ;;  %v261_v16 = vld [vmem:[%s530_s3] ss:$0 sm:$0xff]  ;;  %s404_s3 = smov [#allocation9]  }
  0x39   :  { %272 = vmatpush3.bf16.msra.mxu0 %v295_v1  ;;  %278 = vmatpush3.bf16.msra.mxu1 %v297_v3  ;;  %v265_v21 = vld [vmem:[%s531_s4] ss:$0 sm:$0xff]  ;;  %s241_s12 = sshll.u32 %s404_s3, 4  ;;  %s242_s12 = int_to_ptr.vmem [resolvable:$true] %s241_s12 }
  0x3a   :  { %279 = vmatprep.subr.bf16.mxu1 %v402_v0  ;;  %s369_s4 = scalar_lea.vmem %s242_s12, 256  ;;  %p374_p11 = scmp.lt.s32.totalorder %s242_s12, %s242_s12 }
  0x3b   :  { %p370_p10 = scmp.ne.s32.totalorder %s242_s12, %s369_s4  ;;  %p375_p12 = scmp.lt.s32.totalorder %s369_s4, %s369_s4 }
  0x3c   :  { %274 = vmatmul.mubr.msk.bf16.vlgmr.msra.gmra.mrb[0].mxu0 %vm89_vm2, %v296_v2 }
  0x3d   :  { %280 = vmatpush3.bf16.msra.mxu1 %v298_v4  ;;  %p376_p13 = por %p375_p12, %p374_p11 }
  0x3e   :  { %v72_v5 = vld [vmem:[#allocation2] sm:$0xff]  ;;  %v73_v7 = vld [vmem:[#allocation2 + $0x8] sm:$0xff] }
  0x3f   :  { %p377_p0 = pnand %p376_p13, %p370_p10 }
 0x10f   :  { %v127_v6 = vpop.f32.mrb[0].mxu0 }
 0x110   :  { %v134_v8 = vadd.f32 %v127_v6, %v72_v5  ;;  %v275_v9 = vpop.f32.mrb[1].mxu0 }
 0x111   :  { %v130_v10 = vpop.f32.mrb[2].mxu0 }
 0x112   :  { %137 = vst.msk [vmem:[#allocation2] sm:$0xff] %vm69_vm0, %v134_v8  ;;  %v135_v11 = vadd.f32 %v130_v10, %v73_v7  ;;  %v276_v12 = vpop.f32.mrb[3].mxu0 }
 0x114   :  { %138 = vst.msk [vmem:[#allocation2 + $0x8] sm:$0xff] %vm69_vm0, %v135_v11 }
 0x119   :  { %v142_v13 = vld [vmem:[#allocation2] sm:$0xff] }
 0x11b   :  { %v143_v14 = vld [vmem:[#allocation2 + $0x8] sm:$0xff] }
 0x11c   :  { %v144_v15 = vpack.c.bf16 %v143_v14, %v142_v13 }
 0x11e   :  { %282 = vmatmul.mubr.msk.bf16.vlgmr.msra.gmra.mrb[0].mxu1 %vm69_vm0, %v144_v15 }
 0x1f1   :  { %v205_v17 = vpop.f32.mrb[0].mxu1 }
 0x1f2   :  { %v206_v18 = vadd.f32 %v261_v16, %v205_v17  ;;  %v283_v19 = vpop.f32.mrb[1].mxu1 }
 0x1f3   :  { %v208_v20 = vpop.f32.mrb[2].mxu1 }
 0x1f4   :  { %v212_v22 = vmax.f32 %v206_v18, 0.0  ;;  %v209_v23 = vadd.f32 %v261_v16, %v208_v20  ;;  %v284_v24 = vpop.f32.mrb[3].mxu1 }
 0x1f6   :  { %214 = vst.msk [vmem:[#allocation9] sm:$0xff] %vm69_vm0, %v212_v22  ;;  %v213_v25 = vmax.f32 %v209_v23, 0.0  ;;  %v223_v26 = vmul.f32 %v265_v21, %v212_v22 }
 0x1f8   :  { %215 = vst.msk [vmem:[#allocation9 + $0x8] sm:$0xff] %vm69_vm0, %v213_v25  ;;  %v225_v27 = vsel %vm69_vm0, %v223_v26, 0.0  ;;  %v224_v28 = vmul.f32 %v265_v21, %v213_v25 }
 0x1f9   :  { %226 = vadd.xlane.f32.xlu0 %v225_v27 }
 0x1fa   :  { %v228_v29 = vsel %vm69_vm0, %v224_v28, 0.0 }
 0x1fd   :  { %229 = vadd.xlane.f32.xlu0 %v228_v29 }
 0x1fe   :  { %380 = shalt.err (!%p377_p0)
}
 0x1ff   :  { %s381_s15 = scalar_lea.hbm %s532_s5, 256 }
 0x200   :  { %p382_p1 = scmp.ne.s32.totalorder %s532_s5, %s381_s15  ;;  %p385_p2 = scmp.lt.u32.totalorder %s381_s15, %s532_s5 }
 0x202   :  { %p387_p3 = pnand %p385_p2, %p382_p1 }
 0x204   :  { %390 = shalt.err (!%p387_p3)
}
 0x205   :  { %s405_s20 = smov 128   ;;  %s406_s1 = smov 8   ;;  %vm233_vm3 = vcmask 7168  }
 0x206   :  { %247 = dma.vmem_to_hbm [thread:$0]  %s242_s12, 256, %s532_s5, [#allocation5], %s405_s20, %s405_s20, %s406_s1  }
 0x286   :  { %v227_v30 = vpop.xlane.xlu0 %226 }
 0x287   :  { %299 = vtanh.f32 %v227_v30 }
 0x28a   :  { %v230_v31 = vpop.xlane.xlu0 %229 }
 0x28b   :  { %301 = vtanh.f32 %v230_v31 }
 0x291   :  { %v300_v32 = vpop.eup %299 }
 0x292   :  { %234 = vst.msk [vmem:[%s533_s6] sm:$0xff] %vm233_vm3, %v300_v32 }
 0x295   :  { %v302_v33 = vpop.eup %301 }
 0x296   :  { %235 = vst.msk [vmem:[%s533_s6 + $0x8] sm:$0xff] %vm233_vm3, %v302_v33 }
 0x297   :  { %395 = dma.done.wait [#allocation5], 256  }
 0x298   :  { %396 = vsyncadd [#allocation5], 4294967040 }
 0x299   :  { %255 = vsyncpa [#allocation4], 1 }
 0x29a   :  { %256 = vsyncpa [#allocation7], 1 }
 0x29b   :  { %257 = vsyncpa [#allocation5], 1 }

</bundles_post_ra>
